<compile_context>
chip_gen: v6e
topology: v6e:2x2x1
jax: 0.10.0
libtpu: 0.0.40
codegen_flags: <defaults>
</compile_context>

<pallas_src>
import jax
import jax.numpy as jnp
from jax.experimental import pallas as pl
from jax.experimental.pallas import tpu as pltpu

# Scaled-down module constants (original: BUS_NUM=30, HIDDEN_SIZE=128).
FEATURE_NUM = 8      # graph nodes ("bus" mode feature_num)
HIDDEN_SIZE = 32     # hidden size
BATCH = 2


# ----------------------------------------------------------------------------
# Kernels: one GCN layer = tiled matmul (f32 accumulator) + bias + relu
# (+ residual for the second layer).  grid = (M//tm, N//tn, K//tk), K last.
# ----------------------------------------------------------------------------
def _gcn_layer_kernel(x_ref, w_ref, b_ref, o_ref, acc_ref):
    @pl.when(pl.program_id(2) == 0)
    def _():
        acc_ref[...] = jnp.zeros_like(acc_ref)

    acc_ref[...] += jnp.dot(x_ref[...], w_ref[...],
                            preferred_element_type=jnp.float32)

    @pl.when(pl.program_id(2) == pl.num_programs(2) - 1)
    def _():
        o_ref[...] = jnp.maximum(acc_ref[...] + b_ref[...], 0.0).astype(o_ref.dtype)


def _gcn_layer_residual_kernel(x_ref, w_ref, b_ref, res_ref, o_ref, acc_ref):
    @pl.when(pl.program_id(2) == 0)
    def _():
        acc_ref[...] = jnp.zeros_like(acc_ref)

    acc_ref[...] += jnp.dot(x_ref[...], w_ref[...],
                            preferred_element_type=jnp.float32)

    @pl.when(pl.program_id(2) == pl.num_programs(2) - 1)
    def _():
        y = jnp.maximum(acc_ref[...] + b_ref[...], 0.0)
        o_ref[...] = (y + res_ref[...].astype(jnp.float32)).astype(o_ref.dtype)


def _gcn_layer(x, w, b, res=None, *, out_dtype, tm=None, tn=768, tk=768):
    """relu(x @ w + b) [+ res].  x:(M,K) bf16, w:(K,N) bf16, b:(1,N) f32."""
    M, K = x.shape
    N = w.shape[1]
    tm = M if tm is None else min(tm, M)
    tn = min(tn, N)
    tk = min(tk, K)
    assert M % tm == 0 and N % tn == 0 and K % tk == 0
    grid = (M // tm, N // tn, K // tk)

    in_specs = [
        pl.BlockSpec((tm, tk), lambda i, j, k: (i, k)),   # activations (bf16)
        pl.BlockSpec((tk, tn), lambda i, j, k: (k, j)),   # folded weights (bf16)
        pl.BlockSpec((1, tn), lambda i, j, k: (0, j)),    # folded bias (f32)
    ]
    args = [x, w, b]
    if res is None:
        kernel = _gcn_layer_kernel
    else:
        kernel = _gcn_layer_residual_kernel
        in_specs.append(pl.BlockSpec((tm, tn), lambda i, j, k: (i, j)))
        args.append(res)

    return pl.pallas_call(
        kernel,
        out_shape=jax.ShapeDtypeStruct((M, N), out_dtype),
        grid_spec=pltpu.PrefetchScalarGridSpec(
            num_scalar_prefetch=0,
            grid=grid,
            in_specs=in_specs,
            out_specs=pl.BlockSpec((tm, tn), lambda i, j, k: (i, j)),
            scratch_shapes=[pltpu.VMEM((tm, tn), jnp.float32)],
        ),
        compiler_params=pltpu.CompilerParams(
            dimension_semantics=("parallel", "parallel", "arbitrary")),
    )(*args)


# ----------------------------------------------------------------------------
# Init-time parameter preparation: fold A_hat into the linear weights/biases.
#   (x @ W^T + b) @ kron(I_H, A_hat^T)  ==  x @ W_eff + b_eff
# Done once (not per forward call); outputs are bf16 weights + f32 biases.
# ----------------------------------------------------------------------------
def prepare_gcn_params(w1, b1, w2, b2, a_hat, hidden, n):
    f = hidden * n
    a = a_hat.astype(jnp.float32)

    def fold(w, b):
        wt = w.T.astype(jnp.float32).reshape(f, hidden, n)
        w_eff = jnp.einsum("fhm,nm->fhn", wt, a).reshape(f, f)
        b_eff = jnp.einsum("hm,nm->hn", b.astype(jnp.float32).reshape(hidden, n),
                           a).reshape(1, f)
        return w_eff.astype(jnp.bfloat16), b_eff  # bias stays f32

    w1e, b1e = fold(w1, b1)
    w2e, b2e = fold(w2, b2)
    return w1e, b1e, w2e, b2e


def gcn_block_forward(x, params):
    """x: (B, H, N) float32 -> (B, H, N) float32 (same semantics as PyTorch)."""
    w1e, b1e, w2e, b2e = params
    B, H, N = x.shape
    f = H * N

    x_flat = x.reshape(B, f).astype(jnp.bfloat16)
    m_pad = ((B + 7) // 8) * 8                      # sublane-multiple batch
    if m_pad != B:
        x_flat = jnp.pad(x_flat, ((0, m_pad - B), (0, 0)))

    h1 = _gcn_layer(x_flat, w1e, b1e, out_dtype=jnp.bfloat16)          # layer 1
    out = _gcn_layer(h1, w2e, b2e, res=h1, out_dtype=jnp.float32)      # layer 2 + residual
    return out[:B].reshape(B, H, N)


# ----------------------------------------------------------------------------
# Pure-JAX reference (mirrors the PyTorch forward exactly, f32 end to end).
# ----------------------------------------------------------------------------
def gcn_block_ref(x, w1, b1, w2, b2, a_hat):
    B, H, N = x.shape
    xf = x.reshape(B, -1)
    y = xf @ w1.T + b1
    y = jnp.transpose(y.reshape(B, H, N), (0, 2, 1))            # (B, N, H)
    y = jnp.transpose(jnp.einsum("nm,bmh->bnh", a_hat, y), (0, 2, 1))
    h1 = jnp.maximum(y, 0.0)                                    # (B, H, N)
    y2 = h1.reshape(B, -1) @ w2.T + b2
    y2 = jnp.transpose(y2.reshape(B, H, N), (0, 2, 1))
    y2 = jnp.transpose(jnp.einsum("nm,bmh->bnh", a_hat, y2), (0, 2, 1))
    return jnp.maximum(y2, 0.0) + h1


def make_a_hat(n):
    """Deterministic ring graph in place of the CSV adjacency; same A_hat math."""
    idx = jnp.arange(n)
    diff = (idx[:, None] - idx[None, :]) % n
    adj = ((diff == 1) | (diff == (n - 1))).astype(jnp.float32)
    g = adj + jnp.eye(n, dtype=jnp.float32)                 # graph + I
    d = jnp.sum(g, axis=-1) ** (-0.5)                       # D^{-1/2}
    return (d[:, None] * g) * d[None, :]                    # D^{-1/2} G D^{-1/2}


if __name__ == "__main__":
    B, H, N = BATCH, HIDDEN_SIZE, FEATURE_NUM
    F = H * N

    key = jax.random.PRNGKey(0)
    kx, k1, k2, k3, k4 = jax.random.split(key, 5)

    x = jax.random.normal(kx, (B, H, N), dtype=jnp.float32)

    # nn.Linear default init: U(-1/sqrt(fan_in), 1/sqrt(fan_in))
    bound = 1.0 / jnp.sqrt(jnp.float32(F))
    w1 = jax.random.uniform(k1, (F, F), jnp.float32, -bound, bound)
    b1 = jax.random.uniform(k2, (F,), jnp.float32, -bound, bound)
    w2 = jax.random.uniform(k3, (F, F), jnp.float32, -bound, bound)
    b2 = jax.random.uniform(k4, (F,), jnp.float32, -bound, bound)

    a_hat = make_a_hat(N)

    # Init-time (hoisted out of the forward path): fold A_hat, transpose, cast.
    params = jax.tree_util.tree_map(
        jax.block_until_ready, prepare_gcn_params(w1, b1, w2, b2, a_hat, H, N))

    fwd = jax.jit(gcn_block_forward)
    out = jax.block_until_ready(fwd(x, params))
    ref = jax.block_until_ready(gcn_block_ref(x, w1, b1, w2, b2, a_hat))

    assert out.shape == (B, H, N)
    max_err = jnp.max(jnp.abs(out - ref))
    # bf16 weights/activations vs. f32 reference -> loosened tolerance.
    assert jnp.allclose(out, ref, atol=5e-2, rtol=5e-2), f"max abs err = {max_err}"
    print("KERNEL_OK")
</pallas_src>

<mosaic_0001>
module attributes {stable_mosaic.version = 11 : i64} {
  func.func @_gcn_layer_kernel(%arg0: i32, %arg1: i32, %arg2: i32, %arg3: memref<8x256xbf16, #tpu.memory_space<vmem>>, %arg4: memref<256x256xbf16, #tpu.memory_space<vmem>>, %arg5: memref<1x256xf32, #tpu.memory_space<vmem>>, %arg6: memref<8x256xbf16, #tpu.memory_space<vmem>>, %arg7: memref<8x256xf32, #tpu.memory_space<vmem>>) attributes {dimension_semantics = [#tpu.dimension_semantics<parallel>, #tpu.dimension_semantics<parallel>, #tpu.dimension_semantics<arbitrary>], iteration_bounds = array<i64: 1, 1, 1>, scalar_prefetch = 0 : i64, scratch_operands = 1 : i64, tpu.core_type = #tpu.core_type<tc>, window_params = [{transform_indices = @transform_0, window_bounds = array<i64: 8, 256>}, {transform_indices = @transform_1, window_bounds = array<i64: 256, 256>}, {transform_indices = @transform_2, window_bounds = array<i64: 1, 256>}, {transform_indices = @transform_3, window_bounds = array<i64: 8, 256>}]} {
    %c0_i32 = arith.constant 0 : i32
    %0 = arith.cmpi eq, %arg2, %c0_i32 : i32
    %1 = arith.extui %0 : i1 to i32
    %c0_i32_0 = arith.constant 0 : i32
    %2 = arith.cmpi ne, %1, %c0_i32_0 : i32
    scf.if %2 {
      %cst_10 = arith.constant 0.000000e+00 : f32
      %12 = vector.broadcast %cst_10 : f32 to vector<8x256xf32>
      %c0_11 = arith.constant 0 : index
      %c0_12 = arith.constant 0 : index
      %13 = vector.load %arg7[%c0_11, %c0_12] : memref<8x256xf32, #tpu.memory_space<vmem>>, vector<8x256xf32>
      tpu.vector_store %arg7[%c0_11, %c0_12], %12 {strides = array<i32>} : memref<8x256xf32, #tpu.memory_space<vmem>>, vector<8x256xf32>,
    } else {
    }
    %c0 = arith.constant 0 : index
    %c0_1 = arith.constant 0 : index
    %3 = vector.load %arg7[%c0, %c0_1] : memref<8x256xf32, #tpu.memory_space<vmem>>, vector<8x256xf32>
    %c0_2 = arith.constant 0 : index
    %c0_3 = arith.constant 0 : index
    %4 = vector.load %arg3[%c0_2, %c0_3] : memref<8x256xbf16, #tpu.memory_space<vmem>>, vector<8x256xbf16>
    %c0_4 = arith.constant 0 : index
    %c0_5 = arith.constant 0 : index
    %5 = vector.load %arg4[%c0_4, %c0_5] : memref<256x256xbf16, #tpu.memory_space<vmem>>, vector<256x256xbf16>
    %cst = arith.constant dense<0.000000e+00> : vector<8x256xf32>
    %6 = tpu.matmul %4, %5, %cst {dimension_numbers = #tpu.dot_dimension_numbers<[1], [0], [0], [1], [0, 0, 1, 1], [], []>} : vector<8x256xbf16>, vector<256x256xbf16>, vector<8x256xf32> -> vector<8x256xf32>
    %7 = arith.addf %3, %6 : vector<8x256xf32>
    %c0_6 = arith.constant 0 : index
    %c0_7 = arith.constant 0 : index
    %8 = vector.load %arg7[%c0_6, %c0_7] : memref<8x256xf32, #tpu.memory_space<vmem>>, vector<8x256xf32>
    tpu.vector_store %arg7[%c0_6, %c0_7], %7 {strides = array<i32>} : memref<8x256xf32, #tpu.memory_space<vmem>>, vector<8x256xf32>,
    %c0_i32_8 = arith.constant 0 : i32
    %9 = arith.cmpi eq, %arg2, %c0_i32_8 : i32
    %10 = arith.extui %9 : i1 to i32
    %c0_i32_9 = arith.constant 0 : i32
    %11 = arith.cmpi ne, %10, %c0_i32_9 : i32
    scf.if %11 {
      %c0_10 = arith.constant 0 : index
      %c0_11 = arith.constant 0 : index
      %12 = vector.load %arg7[%c0_10, %c0_11] : memref<8x256xf32, #tpu.memory_space<vmem>>, vector<8x256xf32>
      %c0_12 = arith.constant 0 : index
      %c0_13 = arith.constant 0 : index
      %13 = vector.load %arg5[%c0_12, %c0_13] : memref<1x256xf32, #tpu.memory_space<vmem>>, vector<1x256xf32>
      %14 = vector.broadcast %13 : vector<1x256xf32> to vector<8x256xf32>
      %15 = arith.addf %12, %14 : vector<8x256xf32>
      %cst_14 = arith.constant 0.000000e+00 : f32
      %16 = vector.broadcast %cst_14 : f32 to vector<8x256xf32>
      %17 = arith.maximumf %15, %16 : vector<8x256xf32>
      %18 = arith.truncf %17 : vector<8x256xf32> to vector<8x256xbf16>
      %c0_15 = arith.constant 0 : index
      %c0_16 = arith.constant 0 : index
      %19 = vector.load %arg6[%c0_15, %c0_16] : memref<8x256xbf16, #tpu.memory_space<vmem>>, vector<8x256xbf16>
      tpu.vector_store %arg6[%c0_15, %c0_16], %18 {strides = array<i32>} : memref<8x256xbf16, #tpu.memory_space<vmem>>, vector<8x256xbf16>,
    } else {
    }
    return
  }
  func.func @transform_0(%arg0: i32, %arg1: i32, %arg2: i32) -> (i32, i32) {
    %c0_i32 = arith.constant 0 : i32
    return %arg0, %arg2 : i32, i32
  }
  func.func @transform_1(%arg0: i32, %arg1: i32, %arg2: i32) -> (i32, i32) {
    %c0_i32 = arith.constant 0 : i32
    return %arg2, %arg1 : i32, i32
  }
  func.func @transform_2(%arg0: i32, %arg1: i32, %arg2: i32) -> (i32, i32) {
    %c0_i32 = arith.constant 0 : i32
    %c0_i32_0 = arith.constant 0 : i32
    return %c0_i32, %arg1 : i32, i32
  }
  func.func @transform_3(%arg0: i32, %arg1: i32, %arg2: i32) -> (i32, i32) {
    %c0_i32 = arith.constant 0 : i32
    return %arg0, %arg1 : i32, i32
  }
}

module attributes {stable_mosaic.version = 11 : i64} {
  func.func @_gcn_layer_residual_kernel(%arg0: i32, %arg1: i32, %arg2: i32, %arg3: memref<8x256xbf16, #tpu.memory_space<vmem>>, %arg4: memref<256x256xbf16, #tpu.memory_space<vmem>>, %arg5: memref<1x256xf32, #tpu.memory_space<vmem>>, %arg6: memref<8x256xbf16, #tpu.memory_space<vmem>>, %arg7: memref<8x256xf32, #tpu.memory_space<vmem>>, %arg8: memref<8x256xf32, #tpu.memory_space<vmem>>) attributes {dimension_semantics = [#tpu.dimension_semantics<parallel>, #tpu.dimension_semantics<parallel>, #tpu.dimension_semantics<arbitrary>], iteration_bounds = array<i64: 1, 1, 1>, scalar_prefetch = 0 : i64, scratch_operands = 1 : i64, tpu.core_type = #tpu.core_type<tc>, window_params = [{transform_indices = @transform_0, window_bounds = array<i64: 8, 256>}, {transform_indices = @transform_1, window_bounds = array<i64: 256, 256>}, {transform_indices = @transform_2, window_bounds = array<i64: 1, 256>}, {transform_indices = @transform_3, window_bounds = array<i64: 8, 256>}, {transform_indices = @transform_4, window_bounds = array<i64: 8, 256>}]} {
    %c0_i32 = arith.constant 0 : i32
    %0 = arith.cmpi eq, %arg2, %c0_i32 : i32
    %1 = arith.extui %0 : i1 to i32
    %c0_i32_0 = arith.constant 0 : i32
    %2 = arith.cmpi ne, %1, %c0_i32_0 : i32
    scf.if %2 {
      %cst_10 = arith.constant 0.000000e+00 : f32
      %12 = vector.broadcast %cst_10 : f32 to vector<8x256xf32>
      %c0_11 = arith.constant 0 : index
      %c0_12 = arith.constant 0 : index
      %13 = vector.load %arg8[%c0_11, %c0_12] : memref<8x256xf32, #tpu.memory_space<vmem>>, vector<8x256xf32>
      tpu.vector_store %arg8[%c0_11, %c0_12], %12 {strides = array<i32>} : memref<8x256xf32, #tpu.memory_space<vmem>>, vector<8x256xf32>,
    } else {
    }
    %c0 = arith.constant 0 : index
    %c0_1 = arith.constant 0 : index
    %3 = vector.load %arg8[%c0, %c0_1] : memref<8x256xf32, #tpu.memory_space<vmem>>, vector<8x256xf32>
    %c0_2 = arith.constant 0 : index
    %c0_3 = arith.constant 0 : index
    %4 = vector.load %arg3[%c0_2, %c0_3] : memref<8x256xbf16, #tpu.memory_space<vmem>>, vector<8x256xbf16>
    %c0_4 = arith.constant 0 : index
    %c0_5 = arith.constant 0 : index
    %5 = vector.load %arg4[%c0_4, %c0_5] : memref<256x256xbf16, #tpu.memory_space<vmem>>, vector<256x256xbf16>
    %cst = arith.constant dense<0.000000e+00> : vector<8x256xf32>
    %6 = tpu.matmul %4, %5, %cst {dimension_numbers = #tpu.dot_dimension_numbers<[1], [0], [0], [1], [0, 0, 1, 1], [], []>} : vector<8x256xbf16>, vector<256x256xbf16>, vector<8x256xf32> -> vector<8x256xf32>
    %7 = arith.addf %3, %6 : vector<8x256xf32>
    %c0_6 = arith.constant 0 : index
    %c0_7 = arith.constant 0 : index
    %8 = vector.load %arg8[%c0_6, %c0_7] : memref<8x256xf32, #tpu.memory_space<vmem>>, vector<8x256xf32>
    tpu.vector_store %arg8[%c0_6, %c0_7], %7 {strides = array<i32>} : memref<8x256xf32, #tpu.memory_space<vmem>>, vector<8x256xf32>,
    %c0_i32_8 = arith.constant 0 : i32
    %9 = arith.cmpi eq, %arg2, %c0_i32_8 : i32
    %10 = arith.extui %9 : i1 to i32
    %c0_i32_9 = arith.constant 0 : i32
    %11 = arith.cmpi ne, %10, %c0_i32_9 : i32
    scf.if %11 {
      %c0_10 = arith.constant 0 : index
      %c0_11 = arith.constant 0 : index
      %12 = vector.load %arg8[%c0_10, %c0_11] : memref<8x256xf32, #tpu.memory_space<vmem>>, vector<8x256xf32>
      %c0_12 = arith.constant 0 : index
      %c0_13 = arith.constant 0 : index
      %13 = vector.load %arg5[%c0_12, %c0_13] : memref<1x256xf32, #tpu.memory_space<vmem>>, vector<1x256xf32>
      %14 = vector.broadcast %13 : vector<1x256xf32> to vector<8x256xf32>
      %15 = arith.addf %12, %14 : vector<8x256xf32>
      %cst_14 = arith.constant 0.000000e+00 : f32
      %16 = vector.broadcast %cst_14 : f32 to vector<8x256xf32>
      %17 = arith.maximumf %15, %16 : vector<8x256xf32>
      %c0_15 = arith.constant 0 : index
      %c0_16 = arith.constant 0 : index
      %18 = vector.load %arg6[%c0_15, %c0_16] : memref<8x256xbf16, #tpu.memory_space<vmem>>, vector<8x256xbf16>
      %19 = arith.extf %18 : vector<8x256xbf16> to vector<8x256xf32>
      %20 = arith.addf %17, %19 : vector<8x256xf32>
      %c0_17 = arith.constant 0 : index
      %c0_18 = arith.constant 0 : index
      %21 = vector.load %arg7[%c0_17, %c0_18] : memref<8x256xf32, #tpu.memory_space<vmem>>, vector<8x256xf32>
      tpu.vector_store %arg7[%c0_17, %c0_18], %20 {strides = array<i32>} : memref<8x256xf32, #tpu.memory_space<vmem>>, vector<8x256xf32>,
    } else {
    }
    return
  }
  func.func @transform_0(%arg0: i32, %arg1: i32, %arg2: i32) -> (i32, i32) {
    %c0_i32 = arith.constant 0 : i32
    return %arg0, %arg2 : i32, i32
  }
  func.func @transform_1(%arg0: i32, %arg1: i32, %arg2: i32) -> (i32, i32) {
    %c0_i32 = arith.constant 0 : i32
    return %arg2, %arg1 : i32, i32
  }
  func.func @transform_2(%arg0: i32, %arg1: i32, %arg2: i32) -> (i32, i32) {
    %c0_i32 = arith.constant 0 : i32
    %c0_i32_0 = arith.constant 0 : i32
    return %c0_i32, %arg1 : i32, i32
  }
  func.func @transform_3(%arg0: i32, %arg1: i32, %arg2: i32) -> (i32, i32) {
    %c0_i32 = arith.constant 0 : i32
    return %arg0, %arg1 : i32, i32
  }
  func.func @transform_4(%arg0: i32, %arg1: i32, %arg2: i32) -> (i32, i32) {
    %c0_i32 = arith.constant 0 : i32
    return %arg0, %arg1 : i32, i32
  }
}

</mosaic_0001>

<bundles_post_ra>
// kernel: gcn_block_forward.3
= control target key start
LH: loop header
LB: loop body
LE: loop exit
PB: predicated region body
PF: predicated region fallthrough
CT: control target
= control target key end

     0   :  { %v277_v35 = vlaneseq  ;;  %s522_s1 = inlined_call_operand.vmem [shape: bf16[256,256], index: 1, kind: input, shape index: {}]   ;;  %s523_s0 = inlined_call_operand.vmem [shape: bf16[8,256], index: 0, kind: input, shape index: {}, may-alias: {0,3}]   ;;  %s524_s2 = inlined_call_operand.vmem [shape: f32[1,256], index: 2, kind: input, shape index: {}]   ;;  %s525_s3 = inlined_call_operand.vmem [shape: bf16[8,256], index: 3, kind: input, shape index: {}, may-alias: {0,3}]   ;;  %s526_s4 = inlined_call_operand.vmem [shape: f32[8,256], index: 4, kind: output, shape index: {}]  }
   0x1   :  { %v336_v0 = vld [vmem:[%s522_s1 + $0x74] ss:$8 sps:$4 sm:$0xff]   ;;  %v338_v1 = vld [vmem:[%s522_s1 + $0x70] ss:$8 sps:$4 sm:$0xff]   ;;  %v339_v2 = vld [vmem:[%s522_s1 + $0x64] ss:$8 sps:$4 sm:$0xff]  }
   0x2   :  { %225 = vmatprep.subr.bf16.mxu0 %v336_v0  ;;  %v341_v3 = vld [vmem:[%s522_s1 + $0x60] ss:$8 sps:$4 sm:$0xff]   ;;  %v342_v4 = vld [vmem:[%s522_s1 + $0x54] ss:$8 sps:$4 sm:$0xff]   ;;  %v344_v5 = vld [vmem:[%s522_s1 + $0x50] ss:$8 sps:$4 sm:$0xff]  }
   0x3   :  { %226 = vmatpush1.bf16.msra.mxu0 %v338_v1  ;;  %v345_v6 = vld [vmem:[%s522_s1 + $0x44] ss:$8 sps:$4 sm:$0xff]   ;;  %v347_v7 = vld [vmem:[%s522_s1 + $0x40] ss:$8 sps:$4 sm:$0xff]   ;;  %v348_v8 = vld [vmem:[%s522_s1 + $0x34] ss:$8 sps:$4 sm:$0xff]  }
   0x4   :  { %227 = vmatprep.subr.bf16.mxu0 %v339_v2  ;;  %v350_v9 = vld [vmem:[%s522_s1 + $0x30] ss:$8 sps:$4 sm:$0xff]   ;;  %v351_v10 = vld [vmem:[%s522_s1 + $0x24] ss:$8 sps:$4 sm:$0xff]   ;;  %v353_v11 = vld [vmem:[%s522_s1 + $0x20] ss:$8 sps:$4 sm:$0xff]  }
   0x5   :  { %v354_v12 = vld [vmem:[%s522_s1 + $0x14] ss:$8 sps:$4 sm:$0xff]   ;;  %v25_v13 = vld [vmem:[%s523_s0] sm:$0xff]  ;;  %v356_v15 = vld [vmem:[%s522_s1 + $0x10] ss:$8 sps:$4 sm:$0xff]   ;;  %v278_v36 = vshrl.u32 %v277_v35, 7 }
   0x6   :  { %v303_v14 = vcombine.high %v25_v13, %v25_v13  ;;  %v357_v16 = vld [vmem:[%s522_s1 + $0x4] ss:$8 sps:$4 sm:$0xff]   ;;  %v359_v17 = vld [vmem:[%s522_s1] ss:$8 sps:$4 sm:$0xff]   ;;  %v360_v18 = vld [vmem:[%s522_s1 + $0xf4] ss:$8 sps:$4 sm:$0xff]   ;;  %v302_v34 = vcombine.low %v25_v13, %v25_v13 }
   0x7   :  { %228 = vmatpush1.bf16.msra.mxu0 %v341_v3  ;;  %v362_v19 = vld [vmem:[%s522_s1 + $0xf0] ss:$8 sps:$4 sm:$0xff]   ;;  %v363_v20 = vld [vmem:[%s522_s1 + $0xe4] ss:$8 sps:$4 sm:$0xff]   ;;  %v365_v21 = vld [vmem:[%s522_s1 + $0xe0] ss:$8 sps:$4 sm:$0xff]  }
   0x8   :  { %229 = vmatprep.subr.bf16.mxu0 %v342_v4  ;;  %257 = vmatprep.mubr.bf16.mxu0 %v303_v14  ;;  %v366_v22 = vld [vmem:[%s522_s1 + $0xd4] ss:$8 sps:$4 sm:$0xff]   ;;  %v368_v23 = vld [vmem:[%s522_s1 + $0xd0] ss:$8 sps:$4 sm:$0xff]   ;;  %v369_v24 = vld [vmem:[%s522_s1 + $0xc4] ss:$8 sps:$4 sm:$0xff]  }
   0x9   :  { %v371_v25 = vld [vmem:[%s522_s1 + $0xc0] ss:$8 sps:$4 sm:$0xff]   ;;  %v372_v26 = vld [vmem:[%s522_s1 + $0xb4] ss:$8 sps:$4 sm:$0xff]   ;;  %v374_v27 = vld [vmem:[%s522_s1 + $0xb0] ss:$8 sps:$4 sm:$0xff]  }
   0xa   :  { %v375_v28 = vld [vmem:[%s522_s1 + $0xa4] ss:$8 sps:$4 sm:$0xff]   ;;  %v377_v29 = vld [vmem:[%s522_s1 + $0xa0] ss:$8 sps:$4 sm:$0xff]   ;;  %v378_v30 = vld [vmem:[%s522_s1 + $0x94] ss:$8 sps:$4 sm:$0xff]  }
   0xb   :  { %230 = vmatpush1.bf16.msra.mxu0 %v344_v5  ;;  %v380_v31 = vld [vmem:[%s522_s1 + $0x90] ss:$8 sps:$4 sm:$0xff]   ;;  %v381_v32 = vld [vmem:[%s522_s1 + $0x84] ss:$8 sps:$4 sm:$0xff]   ;;  %v383_v33 = vld [vmem:[%s522_s1 + $0x80] ss:$8 sps:$4 sm:$0xff]  }
   0xc   :  { %231 = vmatprep.subr.bf16.mxu0 %v345_v6  ;;  %v279_v37 = vsub.s32 0, %v278_v36  ;;  %v275_v38 = vld [vmem:[%s524_s2] sm:$0x3]  ;;  %v283_v39 = vsub.s32 1, %v278_v36 }
   0xd   :  { %v291_v41 = vld [vmem:[%s525_s3] sm:$0xff] }
   0xe   :  { %v280_v40 = vrot.slane %v275_v38, %v279_v37  ;;  %v284_v42 = vrot.slane %v275_v38, %v283_v39  ;;  %v292_v45 = vunpack.c.l.bf16 %v291_v41  ;;  %v293_v49 = vunpack.c.h.bf16 %v291_v41 }
   0xf   :  { %232 = vmatpush1.bf16.msra.mxu0 %v347_v7 }
  0x10   :  { %233 = vmatprep.subr.bf16.mxu0 %v348_v8 }
  0x13   :  { %234 = vmatpush1.bf16.msra.mxu0 %v350_v9 }
  0x14   :  { %235 = vmatprep.subr.bf16.mxu0 %v351_v10 }
  0x17   :  { %236 = vmatpush1.bf16.msra.mxu0 %v353_v11 }
  0x18   :  { %237 = vmatprep.subr.bf16.mxu0 %v354_v12 }
  0x1b   :  { %238 = vmatpush1.bf16.msra.mxu0 %v356_v15 }
  0x1c   :  { %239 = vmatprep.subr.bf16.mxu0 %v357_v16 }
  0x1f   :  { %240 = vmatpush1.bf16.msra.mxu0 %v359_v17 }
  0x20   :  { %241 = vmatprep.subr.bf16.mxu0 %v360_v18 }
  0x23   :  { %242 = vmatpush2.bf16.msra.mxu0 %v362_v19 }
  0x24   :  { %243 = vmatprep.subr.bf16.mxu0 %v363_v20 }
  0x27   :  { %244 = vmatpush2.bf16.msra.mxu0 %v365_v21 }
  0x28   :  { %245 = vmatprep.subr.bf16.mxu0 %v366_v22 }
  0x2b   :  { %246 = vmatpush2.bf16.msra.mxu0 %v368_v23 }
  0x2c   :  { %247 = vmatprep.subr.bf16.mxu0 %v369_v24 }
  0x2f   :  { %248 = vmatpush2.bf16.msra.mxu0 %v371_v25 }
  0x30   :  { %249 = vmatprep.subr.bf16.mxu0 %v372_v26 }
  0x33   :  { %250 = vmatpush2.bf16.msra.mxu0 %v374_v27 }
  0x34   :  { %251 = vmatprep.subr.bf16.mxu0 %v375_v28 }
  0x37   :  { %252 = vmatpush2.bf16.msra.mxu0 %v377_v29 }
  0x38   :  { %253 = vmatprep.subr.bf16.mxu0 %v378_v30 }
  0x3b   :  { %254 = vmatpush2.bf16.msra.mxu0 %v380_v31 }
  0x3c   :  { %255 = vmatprep.subr.bf16.mxu0 %v381_v32 }
  0x3f   :  { %256 = vmatpush2.bf16.msra.mxu0 %v383_v33 }
  0x42   :  { %258 = vmatmul.mubr.bf16.vlgmr.msra.gmra.mxu0 %v302_v34 }
 0x102   :  { %v259_v43 = vpop.f32.mrf.mxu0 }
 0x103   :  { %v287_v44 = vadd.f32 %v280_v40, %v259_v43 }
 0x104   :  { %v261_v46 = vpop.f32.mrf.mxu0 }
 0x105   :  { %v289_v47 = vmax.f32 %v287_v44, 0.0  ;;  %v288_v48 = vadd.f32 %v284_v42, %v261_v46 }
 0x106   :  { %v263_v50 = vpop.f32.mrf.mxu0 }
 0x107   :  { %v294_v51 = vadd.f32 %v292_v45, %v289_v47  ;;  %v290_v52 = vmax.f32 %v288_v48, 0.0 }
 0x108   :  { %v264_v53 = vpop.f32.mrf.mxu0 }
 0x109   :  { %296 = vst [vmem:[%s526_s4] sm:$0xff] %v294_v51  ;;  %v295_v54 = vadd.f32 %v293_v49, %v290_v52 }
 0x10b   :  { %297 = vst [vmem:[%s526_s4 + $0x8] sm:$0xff] %v295_v54 }

// kernel: gcn_block_forward.2
= control target key start
LH: loop header
LB: loop body
LE: loop exit
PB: predicated region body
PF: predicated region fallthrough
CT: control target
= control target key end

     0   :  { %8 = vsyncpa [#allocation4], 0  ;;  %s499_s0 = inlined_call_operand.vmem [shape: bf16[8,256], index: 0, kind: input, shape index: {}]   ;;  %s500_s1 = inlined_call_operand.hbm [shape: bf16[256,256], index: 1, kind: input, shape index: {}]   ;;  %s501_s2 = inlined_call_operand.hbm [shape: f32[1,256], index: 2, kind: input, shape index: {}]   ;;  %s502_s3 = inlined_call_operand.vmem [shape: bf16[8,256], index: 3, kind: output, shape index: {}]  }
   0x1   :  { %9 = vsyncpa [#allocation6], 0  ;;  %s463_s12 = smov [#allocation3]  }
   0x2   :  { %s17_s13 = sshll.u32 %s463_s12, 4  ;;  %s18_s13 = int_to_ptr.vmem [resolvable:$true] %s17_s13 }
   0x3   :  { %s427_s14 = scalar_lea.vmem %s18_s13, 4096  ;;  %p432_p1 = scmp.lt.s32.totalorder %s18_s13, %s18_s13 }
   0x4   :  { %p428_p0 = scmp.ne.s32.totalorder %s18_s13, %s427_s14  ;;  %p433_p2 = scmp.lt.s32.totalorder %s427_s14, %s427_s14 }
   0x6   :  { %p434_p3 = por %p433_p2, %p432_p1 }
   0x8   :  { %p435_p4 = pnand %p434_p3, %p428_p0 }
   0xa   :  { %438 = shalt.err (!%p435_p4)
}
   0xb   :  { %s464_s15 = smov 128   ;;  %s465_s16 = smov 8  }
   0xc   :  { %23 = dma.hbm_to_vmem [thread:$0]  %s500_s1, 4096, %s18_s13, [#allocation4], %s464_s15, %s464_s15, %s465_s16  }
   0xd   :  { %s466_s19 = smov [#allocation5]  }
   0xe   :  { %s30_s20 = sshll.u32 %s466_s19, 4  ;;  %s31_s20 = int_to_ptr.vmem [resolvable:$true] %s30_s20 }
   0xf   :  { %s447_s21 = scalar_lea.vmem %s31_s20, 32  ;;  %p452_p6 = scmp.lt.s32.totalorder %s31_s20, %s31_s20 }
  0x10   :  { %p448_p5 = scmp.ne.s32.totalorder %s31_s20, %s447_s21  ;;  %p453_p7 = scmp.lt.s32.totalorder %s447_s21, %s447_s21 }
  0x12   :  { %p454_p8 = por %p453_p7, %p452_p6 }
  0x14   :  { %p455_p9 = pnand %p454_p8, %p448_p5 }
  0x16   :  { %458 = shalt.err (!%p455_p9)
}
  0x17   :  { %33 = dma.hbm_to_vmem [thread:$0]  %s501_s2, 32, %s31_s20, [#allocation6]  }
  0x18   :  { %459 = dma.done.wait [#allocation4], 4096  }
  0x19   :  { %460 = vsyncadd [#allocation4], 4294963200 }
  0x1a   :  { %461 = dma.done.wait [#allocation6], 32  }
  0x1b   :  { %462 = vsyncadd [#allocation6], 4294967264  ;;  %v369_v0 = vld [vmem:[#allocation3 + $0x74] ss:$8 sps:$4 sm:$0xff]   ;;  %v371_v1 = vld [vmem:[#allocation3 + $0x70] ss:$8 sps:$4 sm:$0xff]   ;;  %v300_v35 = vlaneseq }
  0x1c   :  { %248 = vmatprep.subr.bf16.mxu0 %v369_v0  ;;  %v372_v2 = vld [vmem:[#allocation3 + $0x64] ss:$8 sps:$4 sm:$0xff]   ;;  %v374_v3 = vld [vmem:[#allocation3 + $0x60] ss:$8 sps:$4 sm:$0xff]   ;;  %v375_v4 = vld [vmem:[#allocation3 + $0x54] ss:$8 sps:$4 sm:$0xff]  }
  0x1d   :  { %249 = vmatpush1.bf16.msra.mxu0 %v371_v1  ;;  %v377_v5 = vld [vmem:[#allocation3 + $0x50] ss:$8 sps:$4 sm:$0xff]   ;;  %v378_v6 = vld [vmem:[#allocation3 + $0x44] ss:$8 sps:$4 sm:$0xff]   ;;  %v380_v7 = vld [vmem:[#allocation3 + $0x40] ss:$8 sps:$4 sm:$0xff]  }
  0x1e   :  { %250 = vmatprep.subr.bf16.mxu0 %v372_v2  ;;  %v381_v8 = vld [vmem:[#allocation3 + $0x34] ss:$8 sps:$4 sm:$0xff]   ;;  %v383_v9 = vld [vmem:[#allocation3 + $0x30] ss:$8 sps:$4 sm:$0xff]   ;;  %v384_v10 = vld [vmem:[#allocation3 + $0x24] ss:$8 sps:$4 sm:$0xff]  }
  0x1f   :  { %v386_v11 = vld [vmem:[#allocation3 + $0x20] ss:$8 sps:$4 sm:$0xff]   ;;  %v387_v12 = vld [vmem:[#allocation3 + $0x14] ss:$8 sps:$4 sm:$0xff]   ;;  %v389_v15 = vld [vmem:[#allocation3 + $0x10] ss:$8 sps:$4 sm:$0xff]  }
  0x20   :  { %v48_v13 = vld [vmem:[%s499_s0] sm:$0xff]  ;;  %v393_v18 = vld [vmem:[#allocation3 + $0xf4] ss:$8 sps:$4 sm:$0xff]   ;;  %v395_v19 = vld [vmem:[#allocation3 + $0xf0] ss:$8 sps:$4 sm:$0xff]   ;;  %v301_v36 = vshrl.u32 %v300_v35, 7 }
  0x21   :  { %251 = vmatpush1.bf16.msra.mxu0 %v374_v3  ;;  %v330_v14 = vcombine.high %v48_v13, %v48_v13  ;;  %v390_v16 = vld [vmem:[#allocation3 + $0x4] ss:$8 sps:$4 sm:$0xff]   ;;  %v392_v17 = vld [vmem:[#allocation3] ss:$8 sps:$4 sm:$0xff]   ;;  %v399_v22 = vld [vmem:[#allocation3 + $0xd4] ss:$8 sps:$4 sm:$0xff]   ;;  %v329_v34 = vcombine.low %v48_v13, %v48_v13 }
  0x22   :  { %252 = vmatprep.subr.bf16.mxu0 %v375_v4  ;;  %v396_v20 = vld [vmem:[#allocation3 + $0xe4] ss:$8 sps:$4 sm:$0xff]   ;;  %v398_v21 = vld [vmem:[#allocation3 + $0xe0] ss:$8 sps:$4 sm:$0xff]   ;;  %v401_v23 = vld [vmem:[#allocation3 + $0xd0] ss:$8 sps:$4 sm:$0xff]  }
  0x23   :  { %280 = vmatprep.mubr.bf16.mxu0 %v330_v14  ;;  %v402_v24 = vld [vmem:[#allocation3 + $0xc4] ss:$8 sps:$4 sm:$0xff]   ;;  %v404_v25 = vld [vmem:[#allocation3 + $0xc0] ss:$8 sps:$4 sm:$0xff]   ;;  %v405_v26 = vld [vmem:[#allocation3 + $0xb4] ss:$8 sps:$4 sm:$0xff]  }
  0x24   :  { %v407_v27 = vld [vmem:[#allocation3 + $0xb0] ss:$8 sps:$4 sm:$0xff]   ;;  %v408_v28 = vld [vmem:[#allocation3 + $0xa4] ss:$8 sps:$4 sm:$0xff]   ;;  %v410_v29 = vld [vmem:[#allocation3 + $0xa0] ss:$8 sps:$4 sm:$0xff]  }
  0x25   :  { %253 = vmatpush1.bf16.msra.mxu0 %v377_v5  ;;  %v411_v30 = vld [vmem:[#allocation3 + $0x94] ss:$8 sps:$4 sm:$0xff]   ;;  %v413_v31 = vld [vmem:[#allocation3 + $0x90] ss:$8 sps:$4 sm:$0xff]   ;;  %v414_v32 = vld [vmem:[#allocation3 + $0x84] ss:$8 sps:$4 sm:$0xff]  }
  0x26   :  { %254 = vmatprep.subr.bf16.mxu0 %v378_v6  ;;  %v416_v33 = vld [vmem:[#allocation3 + $0x80] ss:$8 sps:$4 sm:$0xff]   ;;  %v302_v37 = vsub.s32 0, %v301_v36  ;;  %v306_v39 = vsub.s32 1, %v301_v36 }
  0x27   :  { %v298_v38 = vld [vmem:[#allocation5] sm:$0x3] }
  0x28   :  { %v303_v40 = vrot.slane %v298_v38, %v302_v37  ;;  %v307_v41 = vrot.slane %v298_v38, %v306_v39 }
  0x29   :  { %255 = vmatpush1.bf16.msra.mxu0 %v380_v7 }
  0x2a   :  { %256 = vmatprep.subr.bf16.mxu0 %v381_v8 }
  0x2d   :  { %257 = vmatpush1.bf16.msra.mxu0 %v383_v9 }
  0x2e   :  { %258 = vmatprep.subr.bf16.mxu0 %v384_v10 }
  0x31   :  { %259 = vmatpush1.bf16.msra.mxu0 %v386_v11 }
  0x32   :  { %260 = vmatprep.subr.bf16.mxu0 %v387_v12 }
  0x35   :  { %261 = vmatpush1.bf16.msra.mxu0 %v389_v15 }
  0x36   :  { %262 = vmatprep.subr.bf16.mxu0 %v390_v16 }
  0x39   :  { %263 = vmatpush1.bf16.msra.mxu0 %v392_v17 }
  0x3a   :  { %264 = vmatprep.subr.bf16.mxu0 %v393_v18 }
  0x3d   :  { %265 = vmatpush2.bf16.msra.mxu0 %v395_v19 }
  0x3e   :  { %266 = vmatprep.subr.bf16.mxu0 %v396_v20 }
  0x41   :  { %267 = vmatpush2.bf16.msra.mxu0 %v398_v21 }
  0x42   :  { %268 = vmatprep.subr.bf16.mxu0 %v399_v22 }
  0x45   :  { %269 = vmatpush2.bf16.msra.mxu0 %v401_v23 }
  0x46   :  { %270 = vmatprep.subr.bf16.mxu0 %v402_v24 }
  0x49   :  { %271 = vmatpush2.bf16.msra.mxu0 %v404_v25 }
  0x4a   :  { %272 = vmatprep.subr.bf16.mxu0 %v405_v26 }
  0x4d   :  { %273 = vmatpush2.bf16.msra.mxu0 %v407_v27 }
  0x4e   :  { %274 = vmatprep.subr.bf16.mxu0 %v408_v28 }
  0x51   :  { %275 = vmatpush2.bf16.msra.mxu0 %v410_v29 }
  0x52   :  { %276 = vmatprep.subr.bf16.mxu0 %v411_v30 }
  0x55   :  { %277 = vmatpush2.bf16.msra.mxu0 %v413_v31 }
  0x56   :  { %278 = vmatprep.subr.bf16.mxu0 %v414_v32 }
  0x59   :  { %279 = vmatpush2.bf16.msra.mxu0 %v416_v33 }
  0x5c   :  { %281 = vmatmul.mubr.bf16.vlgmr.msra.gmra.mxu0 %v329_v34 }
 0x11c   :  { %v282_v42 = vpop.f32.mrf.mxu0 }
 0x11d   :  { %v310_v43 = vadd.f32 %v303_v40, %v282_v42 }
 0x11e   :  { %v284_v44 = vpop.f32.mrf.mxu0 }
 0x11f   :  { %v311_v45 = vadd.f32 %v307_v41, %v284_v44  ;;  %v312_v47 = vmax.f32 %v310_v43, 0.0 }
 0x120   :  { %v286_v46 = vpop.f32.mrf.mxu0 }
 0x121   :  { %v313_v48 = vmax.f32 %v311_v45, 0.0 }
 0x122   :  { %v287_v49 = vpop.f32.mrf.mxu0 }
 0x123   :  { %v364_v50 = vpack.c.bf16 %v313_v48, %v312_v47 }
 0x125   :  { %322 = vst [vmem:[%s502_s3] sm:$0xff] %v364_v50 }
 0x126   :  { %327 = vsyncpa [#allocation4], 1 }
 0x127   :  { %328 = vsyncpa [#allocation6], 1 }

</bundles_post_ra>
